<compile_context>
chip_gen: v5e
topology: v5e:2x2
jax: 0.10.0
libtpu: 0.0.40
codegen_flags: <defaults>
</compile_context>

<pallas_src>
import jax
import jax.numpy as jnp
from jax.experimental import pallas as pl
from jax.experimental.pallas import tpu as pltpu


def _round_up(n: int, m: int) -> int:
    return ((n + m - 1) // m) * m


# ---------------------------------------------------------------------------
# Pallas kernel: fused  out = relu(x @ W1t) @ W2t   (bf16 operands, f32 accum)
# ---------------------------------------------------------------------------
def tiled_mlp_kernel(x_ref, w1t_ref, w2t_ref, o_ref):
    # layer 1: (TILE_B, D_in_p) @ (D_in_p, H_p) -> f32 accum, then ReLU
    h = jnp.dot(x_ref[...], w1t_ref[...], preferred_element_type=jnp.float32)
    h = jnp.maximum(h, 0.0).astype(jnp.bfloat16)
    # layer 2: (TILE_B, H_p) @ (H_p, D_out_p) -> lane-dense f32 store
    o_ref[...] = jnp.dot(h, w2t_ref[...],
                         preferred_element_type=jnp.float32).astype(o_ref.dtype)


def tiled_mlp(x, w1, w2, *, tile_b=256):
    """x: (B, D_in) f32; w1: (H, D_in) f32; w2: (D_out, H) f32 -> (B, D_out) f32."""
    B, D_in = x.shape
    H = w1.shape[0]
    D_out = w2.shape[0]

    # lane-dense padded dims (zeros contribute nothing to the matmuls)
    D_in_p = _round_up(D_in, 128)
    H_p = _round_up(H, 128)
    D_out_p = _round_up(D_out, 128)
    TILE_B = min(_round_up(B, 8), tile_b)
    B_p = _round_up(B, TILE_B)

    # cast to bf16 + zero-pad; weights pre-transposed to (K, N) layout
    xb = jnp.zeros((B_p, D_in_p), jnp.bfloat16).at[:B, :D_in].set(
        x.astype(jnp.bfloat16))
    w1t = jnp.zeros((D_in_p, H_p), jnp.bfloat16).at[:D_in, :H].set(
        w1.T.astype(jnp.bfloat16))
    w2t = jnp.zeros((H_p, D_out_p), jnp.bfloat16).at[:H, :D_out].set(
        w2.T.astype(jnp.bfloat16))

    out_p = pl.pallas_call(
        tiled_mlp_kernel,
        out_shape=jax.ShapeDtypeStruct((B_p, D_out_p), jnp.float32),
        grid=(B_p // TILE_B,),
        in_specs=[
            # streamed per batch tile (double-buffered by the pipeline)
            pl.BlockSpec((TILE_B, D_in_p), lambda i: (i, 0)),
            # weights: constant block index -> DMA'd once, resident in VMEM
            pl.BlockSpec((D_in_p, H_p), lambda i: (0, 0)),
            pl.BlockSpec((H_p, D_out_p), lambda i: (0, 0)),
        ],
        out_specs=pl.BlockSpec((TILE_B, D_out_p), lambda i: (i, 0)),
        compiler_params=pltpu.CompilerParams(
            dimension_semantics=("parallel",)),
    )(xb, w1t, w2t)

    # strip the lane/batch padding
    return out_p[:B, :D_out]


# ---------------------------------------------------------------------------
# Parameter construction (glue, plain JAX) — mirrors LinearSubnet.set_params /
# set_alphas / alpha_scaling with alpha_param='weight', alpha_type='multiple'.
# ---------------------------------------------------------------------------
def build_tiled_weight(key, out_features, in_features, compression_factor):
    numel = out_features * in_features
    assert numel % compression_factor == 0
    tile_size = numel // compression_factor

    k_w, k_s = jax.random.split(key)
    # deterministic stand-ins for the (untrained) nn.Linear weight & scores
    weight = jax.random.normal(k_w, (out_features, in_features), jnp.float32) * 0.05
    scores = jax.random.normal(k_s, (out_features, in_features), jnp.float32)

    # tile = sign of column-sum of scores reshaped (cf, tile_size)
    score_agg = jnp.sum(scores.reshape(compression_factor, tile_size), axis=0)
    tile = jnp.where(score_agg > 0, 1.0, -1.0)              # (+1/-1) vector

    # per-segment alphas = mean(|weight|) over each flat segment
    abs_w = jnp.abs(weight).reshape(compression_factor, tile_size)
    alphas = jnp.sum(abs_w, axis=1) / tile_size              # (cf,)

    # tiled_vector.tile(cf) -> each segment equals `tile`; scale segment i by alphas[i]
    quant = tile[None, :] * alphas[:, None]                  # (cf, tile_size)
    w_scaled = quant.reshape(out_features, in_features)
    return w_scaled


# ---------------------------------------------------------------------------
# Main
# ---------------------------------------------------------------------------
if __name__ == "__main__":
    batch = 8
    in_features = 784
    hidden_size = 32
    num_classes = 10
    compression_factor = 4

    root = jax.random.PRNGKey(0)
    k_x, k_w1, k_w2 = jax.random.split(root, 3)

    x = jax.random.normal(k_x, (batch, in_features), jnp.float32)

    w1 = build_tiled_weight(k_w1, hidden_size, in_features, compression_factor)  # (32, 784)
    w2 = build_tiled_weight(k_w2, num_classes, hidden_size, compression_factor)  # (10, 32)

    out = tiled_mlp(x, w1, w2)
    out = jax.block_until_ready(out)

    # sanity check vs. pure-JAX f32 reference (bf16 operands -> relaxed tolerance)
    ref = jnp.maximum(x @ w1.T, 0.0) @ w2.T
    assert out.shape == (batch, num_classes)
    assert jnp.allclose(out, ref, atol=5e-2, rtol=5e-2), \
        f"max abs err {float(jnp.max(jnp.abs(out - ref)))}"

    print("KERNEL_OK")
</pallas_src>

<mosaic_0001>
module attributes {stable_mosaic.version = 11 : i64} {
  func.func @tiled_mlp_kernel(%arg0: i32, %arg1: memref<8x896xbf16, #tpu.memory_space<vmem>>, %arg2: memref<896x128xbf16, #tpu.memory_space<vmem>>, %arg3: memref<128x128xbf16, #tpu.memory_space<vmem>>, %arg4: memref<8x128xf32, #tpu.memory_space<vmem>>) attributes {dimension_semantics = [#tpu.dimension_semantics<parallel>], iteration_bounds = array<i64: 1>, scalar_prefetch = 0 : i64, scratch_operands = 0 : i64, tpu.core_type = #tpu.core_type<tc>, window_params = [{transform_indices = @transform_0, window_bounds = array<i64: 8, 896>}, {pipeline_mode = #tpu.pipeline_mode<synchronous>, transform_indices = @transform_1, window_bounds = array<i64: 896, 128>}, {pipeline_mode = #tpu.pipeline_mode<synchronous>, transform_indices = @transform_2, window_bounds = array<i64: 128, 128>}, {transform_indices = @transform_3, window_bounds = array<i64: 8, 128>}]} {
    %c0 = arith.constant 0 : index
    %c0_0 = arith.constant 0 : index
    %0 = vector.load %arg1[%c0, %c0_0] : memref<8x896xbf16, #tpu.memory_space<vmem>>, vector<8x896xbf16>
    %c0_1 = arith.constant 0 : index
    %c0_2 = arith.constant 0 : index
    %1 = vector.load %arg2[%c0_1, %c0_2] : memref<896x128xbf16, #tpu.memory_space<vmem>>, vector<896x128xbf16>
    %cst = arith.constant dense<0.000000e+00> : vector<8x128xf32>
    %2 = tpu.matmul %0, %1, %cst {dimension_numbers = #tpu.dot_dimension_numbers<[1], [0], [0], [1], [0, 0, 1, 1], [], []>} : vector<8x896xbf16>, vector<896x128xbf16>, vector<8x128xf32> -> vector<8x128xf32>
    %cst_3 = arith.constant 0.000000e+00 : f32
    %3 = vector.broadcast %cst_3 : f32 to vector<8x128xf32>
    %4 = arith.maximumf %2, %3 : vector<8x128xf32>
    %5 = arith.truncf %4 : vector<8x128xf32> to vector<8x128xbf16>
    %c0_4 = arith.constant 0 : index
    %c0_5 = arith.constant 0 : index
    %6 = vector.load %arg3[%c0_4, %c0_5] : memref<128x128xbf16, #tpu.memory_space<vmem>>, vector<128x128xbf16>
    %cst_6 = arith.constant dense<0.000000e+00> : vector<8x128xf32>
    %7 = tpu.matmul %5, %6, %cst_6 {dimension_numbers = #tpu.dot_dimension_numbers<[1], [0], [0], [1], [0, 0, 1, 1], [], []>} : vector<8x128xbf16>, vector<128x128xbf16>, vector<8x128xf32> -> vector<8x128xf32>
    %c0_7 = arith.constant 0 : index
    %c0_8 = arith.constant 0 : index
    %8 = vector.load %arg4[%c0_7, %c0_8] : memref<8x128xf32, #tpu.memory_space<vmem>>, vector<8x128xf32>
    tpu.vector_store %arg4[%c0_7, %c0_8], %7 {strides = array<i32>} : memref<8x128xf32, #tpu.memory_space<vmem>>, vector<8x128xf32>,
    return
  }
  func.func @transform_0(%arg0: i32) -> (i32, i32) {
    %c0_i32 = arith.constant 0 : i32
    %c0_i32_0 = arith.constant 0 : i32
    return %arg0, %c0_i32 : i32, i32
  }
  func.func @transform_1(%arg0: i32) -> (i32, i32) {
    %c0_i32 = arith.constant 0 : i32
    %c0_i32_0 = arith.constant 0 : i32
    %c0_i32_1 = arith.constant 0 : i32
    return %c0_i32, %c0_i32_0 : i32, i32
  }
  func.func @transform_2(%arg0: i32) -> (i32, i32) {
    %c0_i32 = arith.constant 0 : i32
    %c0_i32_0 = arith.constant 0 : i32
    %c0_i32_1 = arith.constant 0 : i32
    return %c0_i32, %c0_i32_0 : i32, i32
  }
  func.func @transform_3(%arg0: i32) -> (i32, i32) {
    %c0_i32 = arith.constant 0 : i32
    %c0_i32_0 = arith.constant 0 : i32
    return %arg0, %c0_i32 : i32, i32
  }
}

</mosaic_0001>

<bundles_post_ra>
// kernel: tpu_custom_call.1
= control target key start
LH: loop header
LB: loop body
LE: loop exit
PB: predicated region body
PF: predicated region fallthrough
CT: control target
= control target key end

     0   :  { %8 = vsyncpa [#allocation3], 0  ;;  %s1192_s0 = inlined_call_operand.hbm [shape: bf16[8,896], index: 0, kind: input, shape index: {}]   ;;  %s1193_s1 = inlined_call_operand.hbm [shape: bf16[896,128], index: 1, kind: input, shape index: {}]   ;;  %s1194_s2 = inlined_call_operand.hbm [shape: bf16[128,128], index: 2, kind: input, shape index: {}]   ;;  %s1195_s3 = inlined_call_operand.hbm [shape: f32[8,128], index: 3, kind: output, shape index: {}]  }
   0x1   :  { %9 = vsyncpa [#allocation6], 0  ;;  %s26_s14 = sshll.u32 %s1193_s1, 4  ;;  %s27_s14 = int_to_ptr.hbm [resolvable:$true] %s26_s14 }
   0x2   :  { %10 = vsyncpa [#allocation4], 0  ;;  %s1154_s15 = smov [#allocation5]   ;;  %s16_s19 = sshll.u32 %s1192_s0, 4  ;;  %s17_s19 = int_to_ptr.hbm [resolvable:$true] %s16_s19 }
   0x3   :  { %s28_s16 = sshll.u32 %s1154_s15, 4  ;;  %s1155_s20 = smov 64   ;;  %s29_s16 = int_to_ptr.vmem [resolvable:$true] %s28_s16 }
   0x4   :  { %s1156_s21 = smov 4   ;;  %s1157_s22 = smov [#allocation2]  }
   0x5   :  { %34 = dma.hbm_to_vmem [thread:$0]  %s27_s14, 7168, %s29_s16, [#allocation6], %s1155_s20, %s1155_s20, %s1156_s21  }
   0x6   :  { %s18_s23 = sshll.u32 %s1157_s22, 4  ;;  %s39_s26 = sshll.u32 %s1194_s2, 4  ;;  %s19_s23 = int_to_ptr.vmem [resolvable:$true] %s18_s23  ;;  %s40_s26 = int_to_ptr.hbm [resolvable:$true] %s39_s26 }
   0x7   :  { %21 = dma.hbm_to_vmem [thread:$0]  %s17_s19, 448, %s19_s23, [#allocation3]  }
   0x8   :  { %s1158_s1 = smov [#allocation7]  }
   0x9   :  { %s41_s27 = sshll.u32 %s1158_s1, 4  ;;  %s42_s27 = int_to_ptr.vmem [resolvable:$true] %s41_s27 }
   0xa   :  { %47 = dma.hbm_to_vmem [thread:$0]  %s40_s26, 1024, %s42_s27, [#allocation6], %s1155_s20, %s1155_s20, %s1156_s21  }
   0xb   :  { %1148 = dma.done.wait [#allocation3], 448  }
   0xc   :  { %1149 = vsyncadd [#allocation3], 4294966848 }
   0xd   :  { %1150 = dma.done.wait [#allocation6], 8192  }
   0xe   :  { %1151 = vsyncadd [#allocation6], 4294959104  ;;  %v989_v0 = vld [vmem:[#allocation5 + $0x38] sm:$0xff]  ;;  %v988_v3 = vld [vmem:[#allocation5 + $0x30] sm:$0xff]  ;;  %s1159_s0 = smov [#allocation8]   ;;  %s715_s30 = sshll.u32 %s1195_s3, 4  ;;  %s716_s30 = int_to_ptr.hbm [resolvable:$true] %s715_s30 }
   0xf   :  { %v997_v1 = vld [vmem:[#allocation5 + $0x78] sm:$0xff]  ;;  %537 = vmatpush.bf16.msra.mxu0 %v989_v0  ;;  %v996_v4 = vld [vmem:[#allocation5 + $0x70] sm:$0xff]  ;;  %v987_v7 = vld [vmem:[#allocation5 + $0x28] sm:$0xff]  ;;  %s713_s2 = sshll.u32 %s1159_s0, 4  ;;  %s714_s2 = int_to_ptr.vmem [resolvable:$true] %s713_s2 }
  0x10   :  { %v1005_v2 = vld [vmem:[#allocation5 + $0xb8] sm:$0xff]  ;;  %550 = vmatpush.bf16.msra.mxu1 %v997_v1  ;;  %v1004_v5 = vld [vmem:[#allocation5 + $0xb0] sm:$0xff]  ;;  %v995_v8 = vld [vmem:[#allocation5 + $0x68] sm:$0xff] }
  0x11   :  { %563 = vmatpush.bf16.msra.mxu2 %v1005_v2  ;;  %v1013_v6 = vld [vmem:[#allocation5 + $0xf8] sm:$0xff]  ;;  %v1003_v9 = vld [vmem:[#allocation5 + $0xa8] sm:$0xff]  ;;  %v1012_v10 = vld [vmem:[#allocation5 + $0xf0] sm:$0xff] }
  0x12   :  { %576 = vmatpush.bf16.msra.mxu3 %v1013_v6  ;;  %v986_v11 = vld [vmem:[#allocation5 + $0x20] sm:$0xff]  ;;  %v1011_v14 = vld [vmem:[#allocation5 + $0xe8] sm:$0xff]  ;;  %v985_v15 = vld [vmem:[#allocation5 + $0x18] sm:$0xff] }
  0x13   :  { %538 = vmatpush.bf16.msra.mxu0 %v988_v3  ;;  %v994_v12 = vld [vmem:[#allocation5 + $0x60] sm:$0xff]  ;;  %v993_v16 = vld [vmem:[#allocation5 + $0x58] sm:$0xff]  ;;  %v984_v19 = vld [vmem:[#allocation5 + $0x10] sm:$0xff] }
  0x14   :  { %551 = vmatpush.bf16.msra.mxu1 %v996_v4  ;;  %v1002_v13 = vld [vmem:[#allocation5 + $0xa0] sm:$0xff]  ;;  %v1001_v17 = vld [vmem:[#allocation5 + $0x98] sm:$0xff]  ;;  %v992_v20 = vld [vmem:[#allocation5 + $0x50] sm:$0xff] }
  0x15   :  { %564 = vmatpush.bf16.msra.mxu2 %v1004_v5  ;;  %v1010_v18 = vld [vmem:[#allocation5 + $0xe0] sm:$0xff]  ;;  %v1000_v21 = vld [vmem:[#allocation5 + $0x90] sm:$0xff]  ;;  %v1009_v22 = vld [vmem:[#allocation5 + $0xd8] sm:$0xff] }
  0x16   :  { %577 = vmatpush.bf16.msra.mxu3 %v1012_v10  ;;  %v983_v23 = vld [vmem:[#allocation5 + $0x8] sm:$0xff]  ;;  %v1008_v27 = vld [vmem:[#allocation5 + $0xd0] sm:$0xff]  ;;  %v982_v30 = vld [vmem:[#allocation5] sm:$0xff] }
  0x17   :  { %539 = vmatpush.bf16.msra.mxu0 %v987_v7  ;;  %v991_v24 = vld [vmem:[#allocation5 + $0x48] sm:$0xff]  ;;  %v990_v31 = vld [vmem:[#allocation5 + $0x40] sm:$0xff]  ;;  %v1021_v35 = vld [vmem:[#allocation5 + $0x138] sm:$0xff] }
  0x18   :  { %552 = vmatpush.bf16.msra.mxu1 %v995_v8  ;;  %v60_v25 = vld [vmem:[#allocation2] sm:$0xff]  ;;  %v61_v28 = vld [vmem:[#allocation2 + $0x8] sm:$0xff]  ;;  %v1029_v36 = vld [vmem:[#allocation5 + $0x178] sm:$0xff] }
  0x19   :  { %565 = vmatpush.bf16.msra.mxu2 %v1003_v9  ;;  %v999_v26 = vld [vmem:[#allocation5 + $0x88] sm:$0xff]  ;;  %v180_v29 = vunpack.c.l.b16 %v60_v25  ;;  %v182_v32 = vunpack.c.l.b16 %v61_v28  ;;  %v181_v33 = vunpack.c.h.b16 %v60_v25  ;;  %v998_v34 = vld [vmem:[#allocation5 + $0x80] sm:$0xff]  ;;  %v1037_v37 = vld [vmem:[#allocation5 + $0x1b8] sm:$0xff]  ;;  %v183_v46 = vunpack.c.h.b16 %v61_v28 }
  0x1a   :  { %578 = vmatpush.bf16.msra.mxu3 %v1011_v14  ;;  %v1007_v38 = vld [vmem:[#allocation5 + $0xc8] sm:$0xff]  ;;  %v1020_v42 = vld [vmem:[#allocation5 + $0x130] sm:$0xff]  ;;  %v1006_v45 = vld [vmem:[#allocation5 + $0xc0] sm:$0xff] }
  0x1b   :  { %540 = vmatpush.bf16.msra.mxu0 %v986_v11  ;;  %v187_v39 = vpack.c.b16 %v180_v29, %v180_v29  ;;  %v189_v40 = vpack.c.b16 %v182_v32, %v182_v32  ;;  %v188_v41 = vpack.c.b16 %v181_v33, %v181_v33  ;;  %v1028_v43 = vld [vmem:[#allocation5 + $0x170] sm:$0xff]  ;;  %v1019_v47 = vld [vmem:[#allocation5 + $0x128] sm:$0xff]  ;;  %v190_v50 = vpack.c.b16 %v183_v46, %v183_v46  ;;  %v1018_v51 = vld [vmem:[#allocation5 + $0x120] sm:$0xff] }
  0x1c   :  { %553 = vmatpush.bf16.msra.mxu1 %v994_v12  ;;  %v1036_v44 = vld [vmem:[#allocation5 + $0x1b0] sm:$0xff]  ;;  %v1027_v48 = vld [vmem:[#allocation5 + $0x168] sm:$0xff]  ;;  %v1026_v52 = vld [vmem:[#allocation5 + $0x160] sm:$0xff] }
  0x1d   :  { %566 = vmatpush.bf16.msra.mxu2 %v1002_v13  ;;  %v1035_v49 = vld [vmem:[#allocation5 + $0x1a8] sm:$0xff]  ;;  %v1034_v53 = vld [vmem:[#allocation5 + $0x1a0] sm:$0xff]  ;;  %v1017_v54 = vld [vmem:[#allocation5 + $0x118] sm:$0xff] }
  0x1e   :  { %579 = vmatpush.bf16.msra.mxu3 %v1010_v18  ;;  %v1025_v55 = vld [vmem:[#allocation5 + $0x158] sm:$0xff]  ;;  %v1016_v57 = vld [vmem:[#allocation5 + $0x110] sm:$0xff]  ;;  %v1015_v60 = vld [vmem:[#allocation5 + $0x108] sm:$0xff] }
  0x1f   :  { %541 = vmatpush.bf16.msra.mxu0 %v985_v15  ;;  %v1033_v56 = vld [vmem:[#allocation5 + $0x198] sm:$0xff]  ;;  %v1024_v58 = vld [vmem:[#allocation5 + $0x150] sm:$0xff]  ;;  %v1023_v62 = vld [vmem:[#allocation5 + $0x148] sm:$0xff] }
  0x20   :  { %554 = vmatpush.bf16.msra.mxu1 %v993_v16  ;;  %v1032_v59 = vld [vmem:[#allocation5 + $0x190] sm:$0xff]  ;;  %v1031_v63 = vld [vmem:[#allocation5 + $0x188] sm:$0xff]  ;;  %v63_v0 = vld [vmem:[#allocation2 + $0x18] sm:$0xf] }
  0x21   :  { %567 = vmatpush.bf16.msra.mxu2 %v1001_v17  ;;  %v62_v61 = vld [vmem:[#allocation2 + $0x10] sm:$0xff]  ;;  %v1014_v2 = vld [vmem:[#allocation5 + $0x100] sm:$0xff]  ;;  %v186_v4 = vunpack.c.l.b16 %v63_v0  ;;  %v1043_v12 = vld [vmem:[#allocation7 + $0x28] sm:$0xff] }
  0x22   :  { %580 = vmatpush.bf16.msra.mxu3 %v1009_v22  ;;  %v184_v1 = vunpack.c.l.b16 %v62_v61  ;;  %v185_v3 = vunpack.c.h.b16 %v62_v61  ;;  %v1022_v5 = vld [vmem:[#allocation5 + $0x140] sm:$0xff]  ;;  %v1045_v10 = vld [vmem:[#allocation7 + $0x38] sm:$0xff]  ;;  %v1044_v11 = vld [vmem:[#allocation7 + $0x30] sm:$0xff] }
  0x23   :  { %542 = vmatpush.bf16.msra.mxu0 %v984_v19  ;;  %v1030_v6 = vld [vmem:[#allocation5 + $0x180] sm:$0xff]  ;;  %v193_v9 = vpack.c.b16 %v186_v4, %v186_v4  ;;  %v1041_v14 = vld [vmem:[#allocation7 + $0x18] sm:$0xff]  ;;  %v1040_v15 = vld [vmem:[#allocation7 + $0x10] sm:$0xff] }
  0x24   :  { %555 = vmatpush.bf16.msra.mxu1 %v992_v20  ;;  %v191_v7 = vpack.c.b16 %v184_v1, %v184_v1  ;;  %v192_v8 = vpack.c.b16 %v185_v3, %v185_v3  ;;  %v1042_v13 = vld [vmem:[#allocation7 + $0x20] sm:$0xff]  ;;  %v1039_v18 = vld [vmem:[#allocation7 + $0x8] sm:$0xff] }
  0x25   :  { %568 = vmatpush.bf16.msra.mxu2 %v1000_v21  ;;  %v1038_v19 = vld [vmem:[#allocation7] sm:$0xff] }
  0x26   :  { %581 = vmatpush.bf16.msra.mxu3 %v1008_v27 }
  0x27   :  { %543 = vmatpush.bf16.msra.mxu0 %v983_v23 }
  0x28   :  { %556 = vmatpush.bf16.msra.mxu1 %v991_v24 }
  0x29   :  { %569 = vmatpush.bf16.msra.mxu2 %v999_v26 }
  0x2a   :  { %582 = vmatpush.bf16.msra.mxu3 %v1007_v38 }
  0x2b   :  { %544 = vmatpush.bf16.msra.mxu0 %v982_v30 }
  0x2c   :  { %557 = vmatpush.bf16.msra.mxu1 %v990_v31 }
  0x2d   :  { %570 = vmatpush.bf16.msra.mxu2 %v998_v34 }
  0x2e   :  { %545 = vmatmul.bf16.vlgmr.msra.gmra.mxu0 %v187_v39  ;;  %583 = vmatpush.bf16.msra.mxu3 %v1006_v45 }
  0x2f   :  { %589 = vmatpush.bf16.msrb.mxu0 %v1021_v35  ;;  %558 = vmatmul.bf16.vlgmr.msra.gmra.mxu1 %v188_v41 }
  0x30   :  { %602 = vmatpush.bf16.msrb.mxu1 %v1029_v36  ;;  %571 = vmatmul.bf16.vlgmr.msra.gmra.mxu2 %v189_v40 }
  0x31   :  { %615 = vmatpush.bf16.msrb.mxu2 %v1037_v37  ;;  %584 = vmatmul.bf16.vlgmr.msra.gmra.mxu3 %v190_v50 }
  0x32   :  { %694 = vmatpush.bf16.msrb.mxu3 %v1045_v10 }
  0x33   :  { %590 = vmatpush.bf16.msrb.mxu0 %v1020_v42 }
  0x34   :  { %603 = vmatpush.bf16.msrb.mxu1 %v1028_v43 }
  0x35   :  { %616 = vmatpush.bf16.msrb.mxu2 %v1036_v44 }
  0x36   :  { %695 = vmatpush.bf16.msrb.mxu3 %v1044_v11 }
  0x37   :  { %591 = vmatpush.bf16.msrb.mxu0 %v1019_v47 }
  0x38   :  { %604 = vmatpush.bf16.msrb.mxu1 %v1027_v48 }
  0x39   :  { %617 = vmatpush.bf16.msrb.mxu2 %v1035_v49 }
  0x3a   :  { %696 = vmatpush.bf16.msrb.mxu3 %v1043_v12 }
  0x3b   :  { %592 = vmatpush.bf16.msrb.mxu0 %v1018_v51 }
  0x3c   :  { %605 = vmatpush.bf16.msrb.mxu1 %v1026_v52 }
  0x3d   :  { %618 = vmatpush.bf16.msrb.mxu2 %v1034_v53 }
  0x3e   :  { %697 = vmatpush.bf16.msrb.mxu3 %v1042_v13 }
  0x3f   :  { %593 = vmatpush.bf16.msrb.mxu0 %v1017_v54 }
  0x40   :  { %606 = vmatpush.bf16.msrb.mxu1 %v1025_v55 }
  0x41   :  { %619 = vmatpush.bf16.msrb.mxu2 %v1033_v56 }
  0x42   :  { %698 = vmatpush.bf16.msrb.mxu3 %v1041_v14 }
  0x43   :  { %594 = vmatpush.bf16.msrb.mxu0 %v1016_v57 }
  0x44   :  { %607 = vmatpush.bf16.msrb.mxu1 %v1024_v58 }
  0x45   :  { %620 = vmatpush.bf16.msrb.mxu2 %v1032_v59 }
  0x46   :  { %699 = vmatpush.bf16.msrb.mxu3 %v1040_v15 }
  0x47   :  { %595 = vmatpush.bf16.msrb.mxu0 %v1015_v60 }
  0x48   :  { %608 = vmatpush.bf16.msrb.mxu1 %v1023_v62 }
  0x49   :  { %621 = vmatpush.bf16.msrb.mxu2 %v1031_v63 }
  0x4a   :  { %700 = vmatpush.bf16.msrb.mxu3 %v1039_v18 }
  0x4b   :  { %596 = vmatpush.bf16.msrb.mxu0 %v1014_v2 }
  0x4c   :  { %609 = vmatpush.bf16.msrb.mxu1 %v1022_v5 }
  0x4d   :  { %622 = vmatpush.bf16.msrb.mxu2 %v1030_v6 }
  0x4e   :  { %597 = vmatmul.bf16.vlgmr.msrb.gmra.mxu0 %v191_v7  ;;  %701 = vmatpush.bf16.msrb.mxu3 %v1038_v19 }
  0x4f   :  { %610 = vmatmul.bf16.vlgmr.msrb.gmra.mxu1 %v192_v8 }
  0x50   :  { %623 = vmatmul.bf16.vlgmr.msrb.gmra.mxu2 %v193_v9 }
  0xab   :  { %v546_v16 = vpop.f32.mrf.mxu0 }
  0xac   :  { %v559_v17 = vpop.f32.mrf.mxu1 }
  0xad   :  { %v560_v25 = vadd.f32 %v559_v17, %v546_v16 }
  0xb3   :  { %v572_v20 = vpop.f32.mrf.mxu2  ;;  %v548_v21 = vpop.f32.mrf.mxu0 }
  0xb4   :  { %v561_v22 = vpop.f32.mrf.mxu1  ;;  %v585_v23 = vpop.f32.mrf.mxu3  ;;  %v573_v27 = vadd.f32 %v572_v20, %v560_v25 }
  0xb6   :  { %v586_v28 = vadd.f32 %v585_v23, %v573_v27 }
  0xbb   :  { %v574_v24 = vpop.f32.mrf.mxu2 }
  0xbc   :  { %v587_v26 = vpop.f32.mrf.mxu3 }
  0xcb   :  { %v598_v29 = vpop.f32.mrf.mxu0 }
  0xcc   :  { %v611_v30 = vpop.f32.mrf.mxu1  ;;  %v599_v31 = vadd.f32 %v598_v29, %v586_v28 }
  0xce   :  { %v612_v32 = vadd.f32 %v611_v30, %v599_v31 }
  0xd3   :  { %v624_v33 = vpop.f32.mrf.mxu2  ;;  %v600_v35 = vpop.f32.mrf.mxu0 }
  0xd4   :  { %v625_v34 = vadd.f32 %v624_v33, %v612_v32  ;;  %v613_v36 = vpop.f32.mrf.mxu1 }
  0xd6   :  { %v628_v37 = vmax.f32 %v625_v34, 0.0 }
  0xd8   :  { %v629_v38 = vpack.c.bf16 %v628_v37, %v628_v37 }
  0xda   :  { %702 = vmatmul.bf16.vlgmr.msrb.gmra.mxu3 %v629_v38 }
  0xdb   :  { %v626_v39 = vpop.f32.mrf.mxu2 }
 0x15d   :  { %v703_v40 = vpop.f32.mrf.mxu3 }
 0x15e   :  { %707 = vst [vmem:[#allocation8] sm:$0xff] %v703_v40 }
 0x15f   :  { %718 = dma.vmem_to_hbm [thread:$0]  %s714_s2, 128, %s716_s30, [#allocation4]  }
 0x165   :  { %v705_v41 = vpop.f32.mrf.mxu3 }
 0x166   :  { %1152 = dma.done.wait [#allocation4], 128  }
 0x167   :  { %1153 = vsyncadd [#allocation4], 4294967168 }
 0x168   :  { %723 = vsyncpa [#allocation3], 1 }
 0x169   :  { %724 = vsyncpa [#allocation6], 1 }
 0x16a   :  { %725 = vsyncpa [#allocation4], 1 }

</bundles_post_ra>
